<compile_context>
chip_gen: v7x
topology: tpu7x:2x2x1
jax: 0.10.0
libtpu: 0.0.40
codegen_flags: <defaults>
</compile_context>

<pallas_src>
import functools

import jax
import jax.numpy as jnp
from jax import lax
from jax.experimental import pallas as pl
from jax.experimental.pallas import tpu as pltpu

EPS = 1e-5
LANE = 128
SUBLANE = 8
BLOCK_BYTE_TARGET = 4 << 20  # ~4 MiB of input per pipelined block


# --------------------------------------------------------------------------
# Hardware / tiling helpers
# --------------------------------------------------------------------------
def _vmem_budget_bytes():
    """Per-generation VMEM capacity (fallback to the v7x 64 MiB floor)."""
    try:
        return int(pltpu.get_tpu_info().vmem_capacity_bytes)
    except Exception:
        return 64 << 20


def _pick_tile_d(N, D, itemsize, vmem_cap):
    """Feature tile for the 'full batch resident per block' path.

    Returns None when even an (N, 128) block (double-buffered in+out at input
    dtype, plus fp32 temps) does not fit the VMEM budget -> caller uses the
    two-kernel accumulator path instead.
    """
    budget = int(vmem_cap * 0.6)           # headroom (v7x has only 64 MiB)
    per_lane = N * (4 * itemsize + 8)      # 2x in + 2x out buffers + fp32 temps
    fit_lanes = budget // per_lane

    if D <= LANE:
        # Full feature axis in a single block (block dim == array dim).
        return D if fit_lanes >= D else None
    if fit_lanes < LANE:
        return None

    # Byte-based block cap: keep each input block around BLOCK_BYTE_TARGET so
    # DMAs stay near the HBM roofline even for small N / large D.
    target_lanes = max(LANE, BLOCK_BYTE_TARGET // max(1, N * itemsize))
    tile = min(D, int(fit_lanes), int(target_lanes))
    tile = (tile // LANE) * LANE

    # Megacore: for D >= 256 guarantee >= 2 feature tiles so the "parallel"
    # grid axis can shard across the two TensorCores on v7x.
    if D >= 2 * LANE:
        tile = min(tile, ((D // 2) // LANE) * LANE)

    # Pipeline overlap: prefer >= 4 grid steps when the blocks stay big
    # (>= 512 lanes or >= 2 MiB of input).
    if pl.cdiv(D, tile) < 4:
        cand = ((D // 4) // LANE) * LANE
        if cand >= LANE and (cand >= 512 or cand * N * itemsize >= (2 << 20)):
            tile = min(tile, cand)

    return max(LANE, tile)


def _pick_large_n_tiles(N, D, itemsize, vmem_cap):
    """(tile_n, tile_d) for the two-pass accumulator path (N too big for VMEM)."""
    budget = int(vmem_cap * 0.6)
    tile_d = D if D <= LANE else min(512, (D // LANE) * LANE)
    per_row = tile_d * (4 * itemsize + 8)  # 2x in + 2x out buffers + fp32 temps
    fit_rows = max(SUBLANE, budget // per_row)
    target_rows = max(SUBLANE, BLOCK_BYTE_TARGET // max(1, tile_d * itemsize))
    tile_n = min(N, int(fit_rows), int(target_rows))
    if tile_n < N:
        tile_n = max(SUBLANE, (tile_n // SUBLANE) * SUBLANE)
    return tile_n, tile_d


# --------------------------------------------------------------------------
# Path 1: full batch resident in each (N, tile_d) block
# --------------------------------------------------------------------------
def _bn_fullbatch_kernel(x_ref, gamma_ref, beta_ref, o_ref):
    n = x_ref.shape[0]
    inv_n = jnp.float32(1.0 / n)
    # Two-pass (centered) variance: x is resident in VMEM, so re-reading it is
    # cheap and it avoids E[x^2] - E[x]^2 cancellation. x_ref is re-read per
    # expression instead of binding one long-lived fp32 upcast (keeps live
    # VMEM/vreg pressure low -> bigger tiles fit).
    mean = jnp.sum(x_ref[...].astype(jnp.float32), axis=0, keepdims=True) * inv_n
    var = jnp.sum(jnp.square(x_ref[...].astype(jnp.float32) - mean),
                  axis=0, keepdims=True) * inv_n
    scale = lax.rsqrt(var + EPS) * gamma_ref[...].astype(jnp.float32)
    shift = beta_ref[...].astype(jnp.float32) - mean * scale
    # NOTE: for a ragged last block (D % tile_d != 0) the padded lanes compute
    # garbage stats; they are per-lane isolated and masked on writeback, so
    # valid outputs are unaffected. Do not reduce across lanes here.
    o_ref[...] = (x_ref[...].astype(jnp.float32) * scale + shift).astype(o_ref.dtype)


def _bn_fullbatch(x, gamma2, beta2, tile_d, vmem_cap):
    N, D = x.shape
    grid = (pl.cdiv(D, tile_d),)
    return pl.pallas_call(
        _bn_fullbatch_kernel,
        out_shape=jax.ShapeDtypeStruct((N, D), x.dtype),
        grid=grid,
        in_specs=[
            pl.BlockSpec((N, tile_d), lambda j: (0, j)),
            pl.BlockSpec((1, tile_d), lambda j: (0, j)),
            pl.BlockSpec((1, tile_d), lambda j: (0, j)),
        ],
        out_specs=pl.BlockSpec((N, tile_d), lambda j: (0, j)),
        compiler_params=pltpu.CompilerParams(
            # Feature tiles are independent -> shard across TCs on v7x.
            dimension_semantics=("parallel",),
            # Raise the scoped VMEM limit above the default, with headroom
            # below physical capacity (tiles were budgeted at 0.6x cap).
            vmem_limit_bytes=int(vmem_cap * 3 // 4),
        ),
    )(x, gamma2, beta2)


# --------------------------------------------------------------------------
# Path 2: large N -> two-kernel accumulator path
#   kernel A: per-feature sum / sum-of-squares over batch tiles (fp32 acc)
#   kernel B: fused normalize + affine sweep
# --------------------------------------------------------------------------
def _bn_stats_kernel(x_ref, sum_ref, ssq_ref, *, n_total, tile_n):
    n_idx = pl.program_id(1)

    @pl.when(n_idx == 0)
    def _():
        sum_ref[...] = jnp.zeros_like(sum_ref)
        ssq_ref[...] = jnp.zeros_like(ssq_ref)

    # Mask padded rows of a ragged last batch tile so they don't corrupt sums.
    rows = n_idx * tile_n + lax.broadcasted_iota(jnp.int32, (tile_n, 1), 0)
    x = jnp.where(rows < n_total, x_ref[...].astype(jnp.float32), 0.0)
    sum_ref[...] += jnp.sum(x, axis=0, keepdims=True)
    ssq_ref[...] += jnp.sum(x * x, axis=0, keepdims=True)


def _bn_apply_kernel(x_ref, sum_ref, ssq_ref, gamma_ref, beta_ref, o_ref, *, inv_n):
    inv_n = jnp.float32(inv_n)
    mean = sum_ref[...] * inv_n
    # One-pass variance here (fp32 accumulation + clamp); a fully centered
    # variance would need a third sweep over HBM.
    var = jnp.maximum(ssq_ref[...] * inv_n - mean * mean, 0.0)
    scale = lax.rsqrt(var + EPS) * gamma_ref[...].astype(jnp.float32)
    shift = beta_ref[...].astype(jnp.float32) - mean * scale
    o_ref[...] = (x_ref[...].astype(jnp.float32) * scale + shift).astype(o_ref.dtype)


def _bn_two_pass(x, gamma2, beta2, vmem_cap):
    N, D = x.shape
    tile_n, tile_d = _pick_large_n_tiles(N, D, x.dtype.itemsize, vmem_cap)
    grid = (pl.cdiv(D, tile_d), pl.cdiv(N, tile_n))
    vmem_limit = int(vmem_cap * 3 // 4)

    sums, ssqs = pl.pallas_call(
        functools.partial(_bn_stats_kernel, n_total=N, tile_n=tile_n),
        out_shape=(jax.ShapeDtypeStruct((1, D), jnp.float32),
                   jax.ShapeDtypeStruct((1, D), jnp.float32)),
        grid=grid,
        in_specs=[pl.BlockSpec((tile_n, tile_d), lambda j, n: (n, j))],
        out_specs=(pl.BlockSpec((1, tile_d), lambda j, n: (0, j)),
                   pl.BlockSpec((1, tile_d), lambda j, n: (0, j))),
        compiler_params=pltpu.CompilerParams(
            dimension_semantics=("parallel", "arbitrary"),
            vmem_limit_bytes=vmem_limit,
        ),
    )(x)

    return pl.pallas_call(
        functools.partial(_bn_apply_kernel, inv_n=1.0 / N),
        out_shape=jax.ShapeDtypeStruct((N, D), x.dtype),
        grid=grid,
        in_specs=[
            pl.BlockSpec((tile_n, tile_d), lambda j, n: (n, j)),
            pl.BlockSpec((1, tile_d), lambda j, n: (0, j)),
            pl.BlockSpec((1, tile_d), lambda j, n: (0, j)),
            pl.BlockSpec((1, tile_d), lambda j, n: (0, j)),
            pl.BlockSpec((1, tile_d), lambda j, n: (0, j)),
        ],
        out_specs=pl.BlockSpec((tile_n, tile_d), lambda j, n: (n, j)),
        compiler_params=pltpu.CompilerParams(
            dimension_semantics=("parallel", "parallel"),
            vmem_limit_bytes=vmem_limit,
        ),
    )(x, sums, ssqs, gamma2, beta2)


# --------------------------------------------------------------------------
# Public wrapper
# --------------------------------------------------------------------------
def normalize_batchnorm(x, gamma, beta):
    """BatchNorm1d training-mode forward. x: (N, D); gamma, beta: (D,)."""
    N, D = x.shape
    gamma2 = gamma.reshape(1, D)
    beta2 = beta.reshape(1, D)

    vmem_cap = _vmem_budget_bytes()
    tile_d = _pick_tile_d(N, D, x.dtype.itemsize, vmem_cap)
    if tile_d is not None:
        return _bn_fullbatch(x, gamma2, beta2, tile_d, vmem_cap)
    # Graph-scale N that cannot keep a full batch per block in VMEM.
    return _bn_two_pass(x, gamma2, beta2, vmem_cap)


if __name__ == "__main__":
    key = jax.random.PRNGKey(0)
    N, D = 8, 32  # small shapes: batch=8, hidden dim=32

    kx, kg, kb = jax.random.split(key, 3)
    x = jax.random.normal(kx, (N, D), dtype=jnp.float32)
    # BatchNorm1d default init is gamma=1, beta=0; perturb slightly so the
    # affine path is exercised non-trivially.
    gamma = jnp.ones((D,), jnp.float32) + 0.1 * jax.random.normal(kg, (D,), jnp.float32)
    beta = 0.1 * jax.random.normal(kb, (D,), jnp.float32)

    out = normalize_batchnorm(x, gamma, beta)
    out = jax.block_until_ready(out)

    # Reference (plain JAX) check of training-mode BatchNorm1d semantics.
    mean = jnp.mean(x, axis=0, keepdims=True)
    var = jnp.mean((x - mean) ** 2, axis=0, keepdims=True)
    ref = (x - mean) / jnp.sqrt(var + EPS) * gamma[None, :] + beta[None, :]
    assert jnp.allclose(out, ref, atol=1e-4, rtol=1e-4), "mismatch (fullbatch path)"

    # Also exercise the large-N accumulator path at the same small shape.
    out2 = _bn_two_pass(x, gamma.reshape(1, D), beta.reshape(1, D), _vmem_budget_bytes())
    out2 = jax.block_until_ready(out2)
    assert jnp.allclose(out2, ref, atol=1e-4, rtol=1e-4), "mismatch (two-pass path)"

    print("KERNEL_OK")
</pallas_src>

<mosaic_0001>
module attributes {stable_mosaic.version = 11 : i64} {
  func.func @_bn_fullbatch_kernel(%arg0: i32, %arg1: memref<8x32xf32, #tpu.memory_space<vmem>>, %arg2: memref<1x32xf32, #tpu.memory_space<vmem>>, %arg3: memref<1x32xf32, #tpu.memory_space<vmem>>, %arg4: memref<8x32xf32, #tpu.memory_space<vmem>>) attributes {dimension_semantics = [#tpu.dimension_semantics<parallel>], iteration_bounds = array<i64: 1>, scalar_prefetch = 0 : i64, scratch_operands = 0 : i64, tpu.core_type = #tpu.core_type<tc>, window_params = [{transform_indices = @transform_0, window_bounds = array<i64: 8, 32>}, {transform_indices = @transform_1, window_bounds = array<i64: 1, 32>}, {transform_indices = @transform_2, window_bounds = array<i64: 1, 32>}, {transform_indices = @transform_3, window_bounds = array<i64: 8, 32>}]} {
    %c0 = arith.constant 0 : index
    %c0_0 = arith.constant 0 : index
    %0 = vector.load %arg1[%c0, %c0_0] : memref<8x32xf32, #tpu.memory_space<vmem>>, vector<8x32xf32>
    %cst = arith.constant dense<0.000000e+00> : vector<32xf32>
    %1 = vector.multi_reduction <add>, %0, %cst [0] : vector<8x32xf32> to vector<32xf32>
    %2 = vector.shape_cast %1 : vector<32xf32> to vector<1x32xf32>
    %cst_1 = arith.constant 1.250000e-01 : f32
    %3 = vector.broadcast %cst_1 : f32 to vector<1x32xf32>
    %4 = arith.mulf %2, %3 : vector<1x32xf32>
    %c0_2 = arith.constant 0 : index
    %c0_3 = arith.constant 0 : index
    %5 = vector.load %arg1[%c0_2, %c0_3] : memref<8x32xf32, #tpu.memory_space<vmem>>, vector<8x32xf32>
    %6 = vector.broadcast %4 : vector<1x32xf32> to vector<8x32xf32>
    %7 = arith.subf %5, %6 : vector<8x32xf32>
    %8 = arith.mulf %7, %7 : vector<8x32xf32>
    %cst_4 = arith.constant dense<0.000000e+00> : vector<32xf32>
    %9 = vector.multi_reduction <add>, %8, %cst_4 [0] : vector<8x32xf32> to vector<32xf32>
    %10 = vector.shape_cast %9 : vector<32xf32> to vector<1x32xf32>
    %cst_5 = arith.constant 1.250000e-01 : f32
    %11 = vector.broadcast %cst_5 : f32 to vector<1x32xf32>
    %12 = arith.mulf %10, %11 : vector<1x32xf32>
    %cst_6 = arith.constant 9.99999974E-6 : f32
    %13 = vector.broadcast %cst_6 : f32 to vector<1x32xf32>
    %14 = arith.addf %12, %13 : vector<1x32xf32>
    %15 = math.rsqrt %14 : vector<1x32xf32>
    %c0_7 = arith.constant 0 : index
    %c0_8 = arith.constant 0 : index
    %16 = vector.load %arg2[%c0_7, %c0_8] : memref<1x32xf32, #tpu.memory_space<vmem>>, vector<1x32xf32>
    %17 = arith.mulf %15, %16 : vector<1x32xf32>
    %c0_9 = arith.constant 0 : index
    %c0_10 = arith.constant 0 : index
    %18 = vector.load %arg3[%c0_9, %c0_10] : memref<1x32xf32, #tpu.memory_space<vmem>>, vector<1x32xf32>
    %19 = arith.mulf %4, %17 : vector<1x32xf32>
    %20 = arith.subf %18, %19 : vector<1x32xf32>
    %c0_11 = arith.constant 0 : index
    %c0_12 = arith.constant 0 : index
    %21 = vector.load %arg1[%c0_11, %c0_12] : memref<8x32xf32, #tpu.memory_space<vmem>>, vector<8x32xf32>
    %22 = vector.broadcast %17 : vector<1x32xf32> to vector<8x32xf32>
    %23 = arith.mulf %21, %22 : vector<8x32xf32>
    %24 = vector.broadcast %20 : vector<1x32xf32> to vector<8x32xf32>
    %25 = arith.addf %23, %24 : vector<8x32xf32>
    %c0_13 = arith.constant 0 : index
    %c0_14 = arith.constant 0 : index
    %26 = vector.load %arg4[%c0_13, %c0_14] : memref<8x32xf32, #tpu.memory_space<vmem>>, vector<8x32xf32>
    tpu.vector_store %arg4[%c0_13, %c0_14], %25 {strides = array<i32>} : memref<8x32xf32, #tpu.memory_space<vmem>>, vector<8x32xf32>,
    return
  }
  func.func @transform_0(%arg0: i32) -> (i32, i32) {
    %c0_i32 = arith.constant 0 : i32
    %c0_i32_0 = arith.constant 0 : i32
    return %c0_i32, %arg0 : i32, i32
  }
  func.func @transform_1(%arg0: i32) -> (i32, i32) {
    %c0_i32 = arith.constant 0 : i32
    %c0_i32_0 = arith.constant 0 : i32
    return %c0_i32, %arg0 : i32, i32
  }
  func.func @transform_2(%arg0: i32) -> (i32, i32) {
    %c0_i32 = arith.constant 0 : i32
    %c0_i32_0 = arith.constant 0 : i32
    return %c0_i32, %arg0 : i32, i32
  }
  func.func @transform_3(%arg0: i32) -> (i32, i32) {
    %c0_i32 = arith.constant 0 : i32
    %c0_i32_0 = arith.constant 0 : i32
    return %c0_i32, %arg0 : i32, i32
  }
}

</mosaic_0001>

<bundles_post_ra>
// kernel: tpu_custom_call.1
= control target key start
LH: loop header
LB: loop body
LE: loop exit
PB: predicated region body
PF: predicated region fallthrough
CT: control target
= control target key end

     0   :  { %8 = vsyncpa [#allocation3], 0  ;;  %s189_s0 = inlined_call_operand.hbm [shape: f32[8,32], index: 0, kind: input, shape index: {}]   ;;  %s190_s1 = inlined_call_operand.vmem [shape: f32[1,32], index: 1, kind: input, shape index: {}]   ;;  %s191_s2 = inlined_call_operand.vmem [shape: f32[1,32], index: 2, kind: input, shape index: {}]   ;;  %s192_s3 = inlined_call_operand.hbm [shape: f32[8,32], index: 3, kind: output, shape index: {}]  }
   0x1   :  { %9 = vsyncpa [#allocation4], 0  ;;  %s134_s12 = smov [#allocation2]   ;;  %s86_s16 = scalar_lea.hbm %s189_s0, 128 }
   0x2   :  { %s16_s13 = sshll.u32 %s134_s12, 4  ;;  %p87_p0 = scmp.ne.s32.totalorder %s189_s0, %s86_s16  ;;  %s17_s13 = int_to_ptr.vmem [resolvable:$true] %s16_s13 }
   0x3   :  { %p90_p1 = scmp.lt.u32.totalorder %s86_s16, %s189_s0 }
   0x5   :  { %p92_p2 = pnand %p90_p1, %p87_p0 }
   0x7   :  { %95 = shalt.err (!%p92_p2)
}
   0x8   :  { %s96_s21 = scalar_lea.vmem %s17_s13, 128  ;;  %p101_p4 = scmp.lt.s32.totalorder %s17_s13, %s17_s13 }
   0x9   :  { %p97_p3 = scmp.ne.s32.totalorder %s17_s13, %s96_s21  ;;  %p102_p5 = scmp.lt.s32.totalorder %s96_s21, %s96_s21 }
   0xb   :  { %p103_p6 = por %p102_p5, %p101_p4 }
   0xd   :  { %p104_p7 = pnand %p103_p6, %p97_p3 }
   0xf   :  { %107 = shalt.err (!%p104_p7)
}
  0x10   :  { %19 = dma.hbm_to_vmem [thread:$0]  %s189_s0, 128, %s17_s13, [#allocation3]  }
  0x11   :  { %130 = dma.done.wait [#allocation3], 128  }
  0x12   :  { %131 = vsyncadd [#allocation3], 4294967168  ;;  %vm28_vm0 = vcmask 261120   ;;  %v27_v0 = vld [vmem:[#allocation2] sm:$0xff]  ;;  %v54_v20 = vlaneseq  ;;  %s135_s27 = smov [#allocation5]  }
  0x13   :  { %v29_v1 = vsel %vm28_vm0, %v27_v0, 0.0  ;;  %v49_v22 = vld [vmem:[%s190_s1] sm:$0x1]  ;;  %s73_s28 = sshll.u32 %s135_s27, 4  ;;  %s74_s28 = int_to_ptr.vmem [resolvable:$true] %s73_s28 }
  0x14   :  { %v30_v2 = vrot.slane %v29_v1, 4  ;;  %v55_v21 = vshrl.u32 %v54_v20, 7  ;;  %v51_v26 = vld [vmem:[%s191_s2] sm:$0x1]  ;;  %s108_s29 = scalar_lea.vmem %s74_s28, 128  ;;  %p113_p9 = scmp.lt.s32.totalorder %s74_s28, %s74_s28 }
  0x15   :  { %p109_p8 = scmp.ne.s32.totalorder %s74_s28, %s108_s29  ;;  %p114_p10 = scmp.lt.s32.totalorder %s108_s29, %s108_s29 }
  0x16   :  { %v31_v3 = vadd.f32 %v30_v2, %v29_v1  ;;  %v56_v23 = vsub.s32 0, %v55_v21 }
  0x17   :  { %p115_p11 = por %p114_p10, %p113_p9 }
  0x18   :  { %v32_v4 = vrot.slane %v31_v3, 2 }
  0x19   :  { %p116_p12 = pnand %p115_p11, %p109_p8 }
  0x1a   :  { %v33_v5 = vadd.f32 %v32_v4, %v31_v3 }
  0x1c   :  { %v34_v6 = vrot.slane %v33_v5, 1 }
  0x1e   :  { %v35_v7 = vadd.f32 %v34_v6, %v33_v5 }
  0x20   :  { %v36_v8 = vmul.f32 0.125, %v35_v7 }
  0x22   :  { %v37_v9 = vsub.f32 %v27_v0, %v36_v8 }
  0x24   :  { %v38_v10 = vmul.f32 %v37_v9, %v37_v9 }
  0x26   :  { %v39_v11 = vsel %vm28_vm0, %v38_v10, 0.0 }
  0x27   :  { %v40_v12 = vrot.slane %v39_v11, 4 }
  0x29   :  { %v41_v13 = vadd.f32 %v40_v12, %v39_v11 }
  0x2b   :  { %v42_v14 = vrot.slane %v41_v13, 2 }
  0x2d   :  { %v43_v15 = vadd.f32 %v42_v14, %v41_v13 }
  0x2f   :  { %v44_v16 = vrot.slane %v43_v15, 1 }
  0x31   :  { %v45_v17 = vadd.f32 %v44_v16, %v43_v15 }
  0x33   :  { %v46_v18 = vmul.f32 0.125, %v45_v17 }
  0x35   :  { %v47_v19 = vadd.f32 1e-05, %v46_v18 }
  0x37   :  { %84 = vrsqrt.f32 %v47_v19 }
  0x41   :  { %v85_v24 = vpop.eup %84 }
  0x42   :  { %v50_v25 = vmul.f32 %v85_v24, %v49_v22 }
  0x44   :  { %v52_v27 = vmul.f32 %v50_v25, %v36_v8  ;;  %v57_v28 = vrot.slane %v50_v25, %v56_v23 }
  0x46   :  { %v53_v29 = vsub.f32 %v51_v26, %v52_v27  ;;  %v58_v30 = vmul.f32 %v57_v28, %v27_v0 }
  0x48   :  { %v63_v31 = vrot.slane %v53_v29, %v56_v23 }
  0x4a   :  { %v65_v32 = vadd.f32 %v63_v31, %v58_v30 }
  0x4c   :  { %66 = vst.msk [vmem:[#allocation5] sm:$0xff] %vm28_vm0, %v65_v32 }
  0x4d   :  { %119 = shalt.err (!%p116_p12)
}
  0x4e   :  { %s120_s30 = scalar_lea.hbm %s192_s3, 128 }
  0x4f   :  { %p121_p13 = scmp.ne.s32.totalorder %s192_s3, %s120_s30  ;;  %p124_p0 = scmp.lt.u32.totalorder %s120_s30, %s192_s3 }
  0x51   :  { %p126_p1 = pnand %p124_p0, %p121_p13 }
  0x53   :  { %129 = shalt.err (!%p126_p1)
}
  0x54   :  { %76 = dma.vmem_to_hbm [thread:$0]  %s74_s28, 128, %s192_s3, [#allocation4]  }
  0x55   :  { %132 = dma.done.wait [#allocation4], 128  }
  0x56   :  { %133 = vsyncadd [#allocation4], 4294967168 }
  0x57   :  { %80 = vsyncpa [#allocation3], 1 }
  0x58   :  { %81 = vsyncpa [#allocation4], 1 }

</bundles_post_ra>
